<compile_context>
chip_gen: v5e
topology: v5e:2x2
jax: 0.10.0
libtpu: 0.0.40
codegen_flags: <defaults>
</compile_context>

<pallas_src>
import functools
import math

import jax
import jax.numpy as jnp
from jax import lax
from jax.experimental import pallas as pl
from jax.experimental.pallas import tpu as pltpu


def _channel_attention_kernel(w_ref, x_ref, out_ref,
                              sum_ref, max_ref, pooled_ref,
                              *, hw_total, hw_tile, k):
    """One (batch tile, HW tile) grid step.

    w_ref:      (k,)             Conv1d taps, SMEM (scalar reads).
    x_ref:      (bt, C, hw_tile) input block, native dtype, VMEM.
    out_ref:    (bt, C)          lane-dense output block (written on last HW step).
    sum_ref:    (bt, C)          f32 running spatial sum.
    max_ref:    (bt, C)          f32 running spatial max.
    pooled_ref: (2*bt, C+2*pad)  f32 padded pooled buffer (finalize only).
    """
    j = pl.program_id(1)
    nj = pl.num_programs(1)
    bt, C, _ = x_ref.shape
    pad = (k - 1) // 2

    @pl.when(j == 0)
    def _init():
        sum_ref[...] = jnp.zeros(sum_ref.shape, jnp.float32)
        max_ref[...] = jnp.full(max_ref.shape, -jnp.inf, jnp.float32)

    # Stream this HW block once; feed both reductions, accumulate in f32.
    x = x_ref[...].astype(jnp.float32)                     # (bt, C, hw_tile)

    if hw_total % hw_tile != 0:
        # Tail block: mask out-of-range lanes (0 for the sum, -inf for the max).
        lane = lax.broadcasted_iota(jnp.int32, x.shape, 2)
        valid = (j * hw_tile + lane) < hw_total
        x_sum = jnp.where(valid, x, 0.0)
        x_max = jnp.where(valid, x, -jnp.inf)
    else:
        x_sum = x
        x_max = x

    sum_ref[...] = sum_ref[...] + jnp.sum(x_sum, axis=2)
    max_ref[...] = jnp.maximum(max_ref[...], jnp.max(x_max, axis=2))

    @pl.when(j == nj - 1)
    def _finalize():
        # AdaptiveAvgPool2d(1) / AdaptiveMaxPool2d(1) results, stacked into one
        # zero-padded (2*bt, C + 2*pad) buffer so the channel conv is applied
        # to both in a single fused pass.  Runs once per batch tile (off the
        # streaming path); only the pad columns get zeroed.
        avg = sum_ref[...] * (1.0 / float(hw_total))
        if pad > 0:
            pooled_ref[:, 0:pad] = jnp.zeros((2 * bt, pad), jnp.float32)
            pooled_ref[:, pad + C:2 * pad + C] = jnp.zeros((2 * bt, pad), jnp.float32)
        pooled_ref[0:bt, pad:pad + C] = avg
        pooled_ref[bt:2 * bt, pad:pad + C] = max_ref[...]

        # Conv1d(1, 1, k, padding=(k-1)//2, bias=False) over the channel axis:
        # y[c] = sum_t w[t] * pooled_padded[c + t] (cross-correlation, as torch).
        # k is tiny & static -> unrolled scalar-tap multiply-adds on the VPU.
        y = w_ref[0] * pooled_ref[:, 0:C]
        for t in range(1, k):
            y = y + w_ref[t] * pooled_ref[:, t:t + C]

        s = jax.nn.sigmoid(y)                              # (2*bt, C)
        out_ref[...] = (s[0:bt] + s[bt:2 * bt]).astype(out_ref.dtype)


def _default_hw_tile(HW, bt, C, itemsize):
    # Keep one (bt, C, hw_tile) input block near ~4 MiB: with Pallas double
    # buffering that is ~8 MiB of streaming VMEM -- comfortable on v7x
    # (64 MiB physical / 32 MiB default scoped) and under v5e's 16 MiB default
    # scoped limit -- while staying >= 512 lanes to sit near the HBM roofline.
    if HW <= 1024:
        return HW                                          # full extent (always legal)
    budget_bytes = 4 * 1024 * 1024
    lanes = budget_bytes // max(1, bt * C * itemsize)
    lanes = max(512, (lanes // 128) * 128)
    return int(min(lanes, HW))


def channel_attention(x, conv_w, *, batch_tile=None, hw_tile=None,
                      out_dtype=jnp.float32):
    """x: (N, C, H, W), conv_w: (1, 1, k) -> (N, C, 1, 1) channel attention."""
    N, C, H, W = x.shape
    HW = H * W
    k = int(conv_w.shape[-1])
    pad = (k - 1) // 2

    # Stream activations in their native dtype (no f32 upcast of the big slab).
    x_flat = x.reshape(N, C, HW)
    taps = conv_w.reshape(k).astype(jnp.float32)
    itemsize = jnp.dtype(x_flat.dtype).itemsize

    if batch_tile is None:
        # Multiple of 8 (sublane rule) and >= 2 grid steps when possible so
        # v7x's two TensorCores can split the "parallel" batch axis.
        batch_tile = 8 if (N % 8 == 0 and N >= 16) else N
    if hw_tile is None:
        hw_tile = _default_hw_tile(HW, batch_tile, C, itemsize)

    grid = (pl.cdiv(N, batch_tile), pl.cdiv(HW, hw_tile))

    # VMEM budget: double-buffered x blocks + out block + scratch, with headroom.
    x_block = batch_tile * C * hw_tile * itemsize
    out_block = batch_tile * C * jnp.dtype(out_dtype).itemsize
    scratch = 4 * (2 * batch_tile * C + 2 * batch_tile * (C + 2 * pad))
    vmem_limit = 2 * (2 * x_block + 2 * out_block + scratch)
    vmem_limit = int(min(max(vmem_limit, 8 * 1024 * 1024), 64 * 1024 * 1024))

    cost = pl.CostEstimate(
        flops=3 * N * C * HW + 2 * N * C * (2 * k + 1),
        transcendentals=2 * N * C,
        bytes_accessed=N * C * HW * itemsize
        + N * C * jnp.dtype(out_dtype).itemsize + k * 4,
    )

    kernel = functools.partial(
        _channel_attention_kernel, hw_total=HW, hw_tile=hw_tile, k=k)

    out = pl.pallas_call(
        kernel,
        out_shape=jax.ShapeDtypeStruct((N, C), out_dtype),
        grid=grid,
        in_specs=[
            pl.BlockSpec(memory_space=pltpu.MemorySpace.SMEM),              # conv taps
            pl.BlockSpec((batch_tile, C, hw_tile), lambda b, j: (b, 0, j)),  # x blocks
        ],
        out_specs=pl.BlockSpec((batch_tile, C), lambda b, j: (b, 0)),
        scratch_shapes=[
            pltpu.VMEM((batch_tile, C), jnp.float32),                  # running sum
            pltpu.VMEM((batch_tile, C), jnp.float32),                  # running max
            pltpu.VMEM((2 * batch_tile, C + 2 * pad), jnp.float32),    # pooled (finalize)
        ],
        compiler_params=pltpu.CompilerParams(
            dimension_semantics=("parallel", "arbitrary"),
            vmem_limit_bytes=vmem_limit,
        ),
        cost_estimate=cost,
    )(taps, x_flat)

    return out.reshape(N, C, 1, 1)


def _reference(x, conv_w):
    """Pure-JAX reference matching the PyTorch forward (f32, elementwise conv)."""
    N, C, H, W = x.shape
    k = conv_w.shape[-1]
    pad = (k - 1) // 2
    taps = conv_w.reshape(-1).astype(jnp.float32)
    xf = x.astype(jnp.float32)
    avg = xf.mean(axis=(2, 3))                             # (N, C)
    mx = xf.max(axis=(2, 3))                               # (N, C)

    def conv1d(p):
        pp = jnp.pad(p, ((0, 0), (pad, pad)))
        out = jnp.zeros_like(p)
        for t in range(k):
            out = out + taps[t] * pp[:, t:t + C]
        return out

    res = jax.nn.sigmoid(conv1d(avg)) + jax.nn.sigmoid(conv1d(mx))
    return res.reshape(N, C, 1, 1)


if __name__ == "__main__":
    # Module hyperparameters (mirrors ChannelAttention.__init__): C=32 -> k=3.
    C = 32
    gamma, b = 2, 1
    t = int(abs((math.log2(C) + b) / gamma))
    ksz = t if t % 2 else t + 1
    bound = 1.0 / math.sqrt(ksz)

    key = jax.random.PRNGKey(0)
    k1, k2, kw = jax.random.split(key, 3)
    conv_w = jax.random.uniform(
        kw, (1, 1, ksz), minval=-bound, maxval=bound, dtype=jnp.float32)

    # Case 1: f32, batch axis split into 2 "parallel" steps, 2-step HW reduction.
    x1 = jax.random.normal(k1, (16, C, 16, 16), dtype=jnp.float32)
    out1 = jax.block_until_ready(channel_attention(x1, conv_w, hw_tile=128))
    ref1 = jax.block_until_ready(_reference(x1, conv_w))
    assert out1.shape == (16, C, 1, 1)
    assert jnp.allclose(out1, ref1, atol=1e-5, rtol=1e-5)

    # Case 2: native bf16 streaming, HW=400 -> 4 HW steps with a masked tail.
    x2 = jax.random.normal(k2, (8, C, 20, 20), dtype=jnp.float32).astype(jnp.bfloat16)
    out2 = jax.block_until_ready(channel_attention(x2, conv_w, hw_tile=128))
    ref2 = jax.block_until_ready(_reference(x2, conv_w))
    assert out2.shape == (8, C, 1, 1)
    assert jnp.allclose(out2, ref2, atol=1e-5, rtol=1e-5)

    print("KERNEL_OK")
</pallas_src>

<mosaic_0001>
module attributes {stable_mosaic.version = 11 : i64} {
  func.func @_channel_attention_kernel(%arg0: i32, %arg1: i32, %arg2: memref<3xf32, #tpu.memory_space<smem>>, %arg3: memref<8x32x128xf32, #tpu.memory_space<vmem>>, %arg4: memref<8x32xf32, #tpu.memory_space<vmem>>, %arg5: memref<8x32xf32, #tpu.memory_space<vmem>>, %arg6: memref<8x32xf32, #tpu.memory_space<vmem>>, %arg7: memref<16x34xf32, #tpu.memory_space<vmem>>) attributes {dimension_semantics = [#tpu.dimension_semantics<parallel>, #tpu.dimension_semantics<arbitrary>], iteration_bounds = array<i64: 2, 2>, scalar_prefetch = 0 : i64, scratch_operands = 3 : i64, tpu.core_type = #tpu.core_type<tc>, window_params = [{transform_indices = @transform_0, window_bounds = array<i64: 3>}, {transform_indices = @transform_1, window_bounds = array<i64: 8, 32, 128>}, {transform_indices = @transform_2, window_bounds = array<i64: 8, 32>}]} {
    %c0_i32 = arith.constant 0 : i32
    %0 = arith.cmpi eq, %arg1, %c0_i32 : i32
    %1 = arith.extui %0 : i1 to i32
    %c0_i32_0 = arith.constant 0 : i32
    %2 = arith.cmpi ne, %1, %c0_i32_0 : i32
    scf.if %2 {
      %cst_13 = arith.constant 0.000000e+00 : f32
      %15 = vector.broadcast %cst_13 : f32 to vector<8x32xf32>
      %c0_14 = arith.constant 0 : index
      %c0_15 = arith.constant 0 : index
      %16 = vector.load %arg5[%c0_14, %c0_15] : memref<8x32xf32, #tpu.memory_space<vmem>>, vector<8x32xf32>
      tpu.vector_store %arg5[%c0_14, %c0_15], %15 {strides = array<i32>} : memref<8x32xf32, #tpu.memory_space<vmem>>, vector<8x32xf32>,
      %cst_16 = arith.constant 0xFF800000 : f32
      %17 = vector.broadcast %cst_16 : f32 to vector<8x32xf32>
      %c0_17 = arith.constant 0 : index
      %c0_18 = arith.constant 0 : index
      %18 = vector.load %arg6[%c0_17, %c0_18] : memref<8x32xf32, #tpu.memory_space<vmem>>, vector<8x32xf32>
      tpu.vector_store %arg6[%c0_17, %c0_18], %17 {strides = array<i32>} : memref<8x32xf32, #tpu.memory_space<vmem>>, vector<8x32xf32>,
    } else {
    }
    %c0 = arith.constant 0 : index
    %c0_1 = arith.constant 0 : index
    %c0_2 = arith.constant 0 : index
    %3 = vector.load %arg3[%c0, %c0_1, %c0_2] : memref<8x32x128xf32, #tpu.memory_space<vmem>>, vector<8x32x128xf32>
    %c0_3 = arith.constant 0 : index
    %c0_4 = arith.constant 0 : index
    %4 = vector.load %arg5[%c0_3, %c0_4] : memref<8x32xf32, #tpu.memory_space<vmem>>, vector<8x32xf32>
    %cst = arith.constant dense<0.000000e+00> : vector<8x32xf32>
    %5 = vector.multi_reduction <add>, %3, %cst [2] : vector<8x32x128xf32> to vector<8x32xf32>
    %6 = arith.addf %4, %5 : vector<8x32xf32>
    %c0_5 = arith.constant 0 : index
    %c0_6 = arith.constant 0 : index
    %7 = vector.load %arg5[%c0_5, %c0_6] : memref<8x32xf32, #tpu.memory_space<vmem>>, vector<8x32xf32>
    tpu.vector_store %arg5[%c0_5, %c0_6], %6 {strides = array<i32>} : memref<8x32xf32, #tpu.memory_space<vmem>>, vector<8x32xf32>,
    %c0_7 = arith.constant 0 : index
    %c0_8 = arith.constant 0 : index
    %8 = vector.load %arg6[%c0_7, %c0_8] : memref<8x32xf32, #tpu.memory_space<vmem>>, vector<8x32xf32>
    %cst_9 = arith.constant dense<0xFF800000> : vector<8x32xf32>
    %9 = vector.multi_reduction <maximumf>, %3, %cst_9 [2] : vector<8x32x128xf32> to vector<8x32xf32>
    %10 = arith.maximumf %8, %9 : vector<8x32xf32>
    %c0_10 = arith.constant 0 : index
    %c0_11 = arith.constant 0 : index
    %11 = vector.load %arg6[%c0_10, %c0_11] : memref<8x32xf32, #tpu.memory_space<vmem>>, vector<8x32xf32>
    tpu.vector_store %arg6[%c0_10, %c0_11], %10 {strides = array<i32>} : memref<8x32xf32, #tpu.memory_space<vmem>>, vector<8x32xf32>,
    %c1_i32 = arith.constant 1 : i32
    %12 = arith.cmpi eq, %arg1, %c1_i32 : i32
    %13 = arith.extui %12 : i1 to i32
    %c0_i32_12 = arith.constant 0 : i32
    %14 = arith.cmpi ne, %13, %c0_i32_12 : i32
    scf.if %14 {
      %c0_13 = arith.constant 0 : index
      %c0_14 = arith.constant 0 : index
      %15 = vector.load %arg5[%c0_13, %c0_14] : memref<8x32xf32, #tpu.memory_space<vmem>>, vector<8x32xf32>
      %cst_15 = arith.constant 3.906250e-03 : f32
      %16 = vector.broadcast %cst_15 : f32 to vector<8x32xf32>
      %17 = arith.mulf %15, %16 : vector<8x32xf32>
      %cst_16 = arith.constant 0.000000e+00 : f32
      %18 = vector.broadcast %cst_16 : f32 to vector<16x1xf32>
      %c0_17 = arith.constant 0 : index
      %c0_18 = arith.constant 0 : index
      %19 = vector.load %arg7[%c0_17, %c0_18] : memref<16x34xf32, #tpu.memory_space<vmem>>, vector<16x1xf32>
      tpu.vector_store %arg7[%c0_17, %c0_18], %18 {strides = array<i32>} : memref<16x34xf32, #tpu.memory_space<vmem>>, vector<16x1xf32>,
      %cst_19 = arith.constant 0.000000e+00 : f32
      %20 = vector.broadcast %cst_19 : f32 to vector<16x1xf32>
      %c0_20 = arith.constant 0 : index
      %c33 = arith.constant 33 : index
      %21 = vector.load %arg7[%c0_20, %c33] : memref<16x34xf32, #tpu.memory_space<vmem>>, vector<16x1xf32>
      tpu.vector_store %arg7[%c0_20, %c33], %20 {strides = array<i32>} : memref<16x34xf32, #tpu.memory_space<vmem>>, vector<16x1xf32>,
      %c0_21 = arith.constant 0 : index
      %c1 = arith.constant 1 : index
      %22 = vector.load %arg7[%c0_21, %c1] : memref<16x34xf32, #tpu.memory_space<vmem>>, vector<8x32xf32>
      tpu.vector_store %arg7[%c0_21, %c1], %17 {strides = array<i32>} : memref<16x34xf32, #tpu.memory_space<vmem>>, vector<8x32xf32>,
      %c0_22 = arith.constant 0 : index
      %c0_23 = arith.constant 0 : index
      %23 = vector.load %arg6[%c0_22, %c0_23] : memref<8x32xf32, #tpu.memory_space<vmem>>, vector<8x32xf32>
      %c8 = arith.constant 8 : index
      %c1_24 = arith.constant 1 : index
      %24 = vector.load %arg7[%c8, %c1_24] : memref<16x34xf32, #tpu.memory_space<vmem>>, vector<8x32xf32>
      tpu.vector_store %arg7[%c8, %c1_24], %23 {strides = array<i32>} : memref<16x34xf32, #tpu.memory_space<vmem>>, vector<8x32xf32>,
      %c0_25 = arith.constant 0 : index
      %25 = memref.load %arg2[%c0_25] : memref<3xf32, #tpu.memory_space<smem>>
      %c0_26 = arith.constant 0 : index
      %c0_27 = arith.constant 0 : index
      %26 = vector.load %arg7[%c0_26, %c0_27] : memref<16x34xf32, #tpu.memory_space<vmem>>, vector<16x32xf32>
      %27 = vector.broadcast %25 : f32 to vector<16x32xf32>
      %28 = arith.mulf %27, %26 : vector<16x32xf32>
      %c1_28 = arith.constant 1 : index
      %29 = memref.load %arg2[%c1_28] : memref<3xf32, #tpu.memory_space<smem>>
      %c0_29 = arith.constant 0 : index
      %c1_30 = arith.constant 1 : index
      %30 = vector.load %arg7[%c0_29, %c1_30] : memref<16x34xf32, #tpu.memory_space<vmem>>, vector<16x32xf32>
      %31 = vector.broadcast %29 : f32 to vector<16x32xf32>
      %32 = arith.mulf %31, %30 : vector<16x32xf32>
      %33 = arith.addf %28, %32 : vector<16x32xf32>
      %c2 = arith.constant 2 : index
      %34 = memref.load %arg2[%c2] : memref<3xf32, #tpu.memory_space<smem>>
      %c0_31 = arith.constant 0 : index
      %c2_32 = arith.constant 2 : index
      %35 = vector.load %arg7[%c0_31, %c2_32] : memref<16x34xf32, #tpu.memory_space<vmem>>, vector<16x32xf32>
      %36 = vector.broadcast %34 : f32 to vector<16x32xf32>
      %37 = arith.mulf %36, %35 : vector<16x32xf32>
      %38 = arith.addf %33, %37 : vector<16x32xf32>
      %39 = arith.negf %38 : vector<16x32xf32>
      %40 = math.exp %39 : vector<16x32xf32>
      %cst_33 = arith.constant 1.000000e+00 : f32
      %41 = vector.broadcast %cst_33 : f32 to vector<16x32xf32>
      %42 = arith.addf %41, %40 : vector<16x32xf32>
      %43 = arith.divf %41, %42 : vector<16x32xf32>
      %44 = vector.extract_strided_slice %43 {offsets = [0, 0], sizes = [8, 32], strides = [1, 1]} : vector<16x32xf32> to vector<8x32xf32>
      %45 = vector.extract_strided_slice %43 {offsets = [8, 0], sizes = [8, 32], strides = [1, 1]} : vector<16x32xf32> to vector<8x32xf32>
      %46 = arith.addf %44, %45 : vector<8x32xf32>
      %c0_34 = arith.constant 0 : index
      %c0_35 = arith.constant 0 : index
      %47 = vector.load %arg4[%c0_34, %c0_35] : memref<8x32xf32, #tpu.memory_space<vmem>>, vector<8x32xf32>
      tpu.vector_store %arg4[%c0_34, %c0_35], %46 {strides = array<i32>} : memref<8x32xf32, #tpu.memory_space<vmem>>, vector<8x32xf32>,
    } else {
    }
    return
  }
  func.func @transform_0(%arg0: i32, %arg1: i32) -> i32 {
    %c0_i32 = arith.constant 0 : i32
    %c0_i32_0 = arith.constant 0 : i32
    return %c0_i32 : i32
  }
  func.func @transform_1(%arg0: i32, %arg1: i32) -> (i32, i32, i32) {
    %c0_i32 = arith.constant 0 : i32
    %c0_i32_0 = arith.constant 0 : i32
    return %arg0, %c0_i32, %arg1 : i32, i32, i32
  }
  func.func @transform_2(%arg0: i32, %arg1: i32) -> (i32, i32) {
    %c0_i32 = arith.constant 0 : i32
    %c0_i32_0 = arith.constant 0 : i32
    return %arg0, %c0_i32 : i32, i32
  }
}

</mosaic_0001>

<bundles_post_ra>
// kernel: tpu_custom_call.1
= control target key start
LH: loop header
LB: loop body
LE: loop exit
PB: predicated region body
PF: predicated region fallthrough
CT: control target
= control target key end

     0   :  { %s1598_s0 = inlined_call_operand.hbm [shape: f32[3], index: 0, kind: input, shape index: {}]   ;;  %s1599_s1 = inlined_call_operand.hbm [shape: f32[16,32,256], index: 1, kind: input, shape index: {}]   ;;  %s1600_s2 = inlined_call_operand.hbm [shape: f32[16,32], index: 2, kind: output, shape index: {}]  }
   0x1   :  { %1610 = sst [smem:[#allocation20_spill]] %s1598_s0 }
   0x2   :  { %1611 = sst [smem:[#allocation21_spill]] %s1600_s2 }
   0x3   :  { %7 = vsyncpa [#allocation8], 0 }
   0x4   :  { %8 = vsyncpa [#allocation6], 0 }
   0x5   :  { %10 = vsyncpa [#allocation6 + $0x1], 0 }
   0x6   :  { %11 = vsyncpa [#allocation7], 0 }
   0x7   :  { %13 = vsyncpa [#allocation7 + $0x1], 0  ;;  %s1137_s9 = smov 0   ;;  %s1139_s10 = smov 0  }
   0x8   :  { %s1141_s11 = smov 0   ;;  %s1143_s12 = smov 0  }
   0x9   :  { %s1145_s13 = smov 0   ;;  %s1147_s14 = smov 0  }
   0xa   :  { %s1149_s15 = smov 0   ;;  %s1151_s16 = smov 0  }
   0xb   :  { %s1153_s17 = smov 0   ;;  %s1155_s18 = smov 0  }
   0xc   :  { %s1157_s19 = smov 0  }
   0xd LB: > { %1612 = sst [smem:[#allocation14_spill]] %s1070_s9  ;;  %s785_s20 = sadd.s32 4294967295, %s1110_s19   ;;  %s1110_s19 = sphi %s1157_s19, %s19_s19   ;;  %s1106_s18 = sphi %s1155_s18, %s1642_s18   ;;  %s1102_s17 = sphi %s1153_s17, %s1634_s17   ;;  %s1098_s16 = sphi %s1151_s16, %s1641_s16   ;;  %s1094_s15 = sphi %s1149_s15, %s1633_s15   ;;  %s1090_s14 = sphi %s1147_s14, %s1640_s14   ;;  %s1086_s13 = sphi %s1145_s13, %s1639_s13   ;;  %s1082_s12 = sphi %s1143_s12, %s1638_s12   ;;  %s1078_s11 = sphi %s1141_s11, %s1637_s11   ;;  %s1074_s10 = sphi %s1139_s10, %s1636_s10   ;;  %s1070_s9 = sphi %s1137_s9, %s1635_s9  }
   0xe   : > { %1613 = sst [smem:[#allocation15_spill]] %s1102_s17  ;;  %s786_s21 = sadd.s32 4294967294, %s1110_s19  }
   0xf   : > { %1614 = sst [smem:[#allocation16_spill]] %s1110_s19  ;;  %p68_p0 = scmp.ne.s32.totalorder %s1090_s14, %s1086_s13 }
  0x10   : > { %p69_p1 = scmp.eq.s32.totalorder %s1110_s19, 0  ;;  %p74_p2 = scmp.ne.s32.totalorder %s1086_s13, %s1082_s12 }
  0x11   : > { %p1197_p3 = scmp.eq.s32.totalorder %s785_s20, 0  ;;  %p97_p5 = scmp.ne.s32.totalorder %s1078_s11, %s1074_s10 }
  0x12   : > { %p1202_p4 = por %p69_p1, %p68_p0  ;;  %p98_p7 = scmp.eq.s32.totalorder %s785_s20, 3 }
  0x13   : > { %p1210_p6 = por %p1197_p3, %p74_p2  ;;  %p103_p8 = scmp.ne.s32.totalorder %s1074_s10, %s1070_s9 }
  0x14   : > { %p104_p9 = scmp.eq.s32.totalorder %s786_s21, 3  ;;  %p1216_p10 = por %p98_p7, %p97_p5 }
  0x15   : > { %p787_p11 = scmp.ge.s32.totalorder %s1110_s19, 1  ;;  %p111_p13 = scmp.lt.s32.totalorder %s1110_s19, 5 }
  0x16   : > { %s1618_s27 = scalar_select %p1216_p10, 1, 0 }
  0x17   : > { %p1221_p12 = por %p104_p9, %p103_p8  ;;  %s1622_s0 = sld [smem:[#allocation20_spill]] }
  0x18   : > { %1619 = sst [smem:[#allocation17_spill]] %s1618_s27  ;;  %p1229_p0 = pnand %p787_p11, %p111_p13 }
  0x19   : > { %s1620_s28 = scalar_select %p1221_p12, 1, 0 }
  0x1a   : > { %p817_p1 = pneg %p1229_p0  ;;  %p830_p2 = scmp.lt.s32.totalorder %s1110_s19, 4 }
  0x1b   : > { %1621 = sst [smem:[#allocation18_spill]] %s1620_s28  ;;  %s1112_s6 = smov [#allocation5]  }
  0x1c   : > { %p818_p5 = pnand %p817_p1, %p1197_p3  ;;  %p1240_p7 = pnand %p830_p2, %p1202_p4 }
  0x1d   : > { %s123_s3 = sshll.u32 %s1622_s0, 4  ;;  %s28_s7 = sadd.s32 1, %s1102_s17  ;;  %s124_s3 = int_to_ptr.hbm [resolvable:$true] %s123_s3 }
  0x1e   : > { %820 = dma.hbm_to_smem (!%p818_p5), %s124_s3, 16, %s1112_s6, [#allocation8]  }
  0x1f   : > { %s31_s8 = sadd.s32 1, %s1106_s18  ;;  %p29_p8 = scmp.ge.s32.totalorder %s28_s7, 2 }
  0x20   : > { %s134_s12 = sand.u32 1, %s1090_s14   ;;  %s808_s25 = sshll.u32 %s1106_s18, 6 }
  0x21   : > { %s790_s20 = sshll.u32 %s134_s12, 8  ;;  %s1644_s7 = smov (%p29_p8, %s28_s7), 0 }
  0x22   : > { %1625 = sst [smem:[#allocation19_spill]] %s1644_s7  ;;  %s1646_s8 = smov (!%p29_p8, %s31_s8), %s1106_s18 }
  0x23   : > { %s57_s21 = ssub.s32 %s1102_s17, %s1644_s7  ;;  %p33_p4 = scmp.ge.s32.totalorder %s1646_s8, 2 }
  0x24   : > { %s143_s29 = sadd.s32 %s1102_s17, %s808_s25  ;;  %s138_s30 = scalar_lea.vmem [#allocation9], %s790_s20 }
  0x25   : > { %s148_s3 = sshll.u32 %s138_s30, 4  ;;  %s1648_s8 = smov (%p33_p4, %s1646_s8), 0  ;;  %s149_s3 = int_to_ptr.vmem [resolvable:$true] %s148_s3 }
  0x26   : > { %s793_s6 = sshll.u32 %s143_s29, 3  ;;  %s56_s22 = ssub.s32 %s1106_s18, %s1648_s8 }
  0x27   : > { %s145_s28 = scalar_lea.hbm %s1599_s1, %s793_s6  ;;  %s58_s9 = sor.u32 %s57_s21, %s56_s22 }
  0x28   : > { %p85_p9 = scmp.eq.s32.totalorder %s56_s22, 0  ;;  %p59_p11 = scmp.eq.s32.totalorder %s58_s9, 0 }
  0x29   : > { %s146_s7 = sshll.u32 %s145_s28, 4  ;;  %s1626_s19 = sadd.s32 1, %s1078_s11  ;;  %s147_s7 = int_to_ptr.hbm [resolvable:$true] %s146_s7 }
  0x2a   : > { %s1264_s2 = scalar_select %p85_p9, %s1078_s11, %s1626_s19  }
  0x2b   : > { %s1627_s20 = sadd.s32 1, %s1090_s14  ;;  %s135_s30 = scalar_lea.sflag [#allocation6], %s134_s12 }
  0x2c   : > { %s1269_s25 = scalar_select %p59_p11, %s1090_s14, %s1627_s20  }
  0x2d   : > { %s1113_s17 = smov 256   ;;  %s1114_s29 = smov 128  }
  0x2e   : > { %s1115_s27 = smov 8   ;;  %160 = sbr.rel (%p1229_p0) target bundleno = 667 (0x29b), region = 28 }
  0x2f   : > { %824 = dma.hbm_to_vmem [thread:$0]  (!%p1240_p7), %s147_s7, 4096, %s149_s3, %s135_s30, %s1113_s17, %s1114_s29, %s1115_s27  }
  0x33   : > { %1057 = dma.done.wait (%p1197_p3), [#allocation8], 16  }
  0x34   : > { %1059 = vsyncadd (%p1197_p3), [#allocation8], 4294967280  ;;  %s167_s0 = sand.u32 1, %s1086_s13  }
  0x35   : > { %s796_s9 = sshll.u32 %s167_s0, 8  ;;  %s168_s19 = scalar_lea.sflag [#allocation6], %s167_s0 }
  0x36   : > { %s1280_s22 = scalar_lea.vmem [#allocation9], %s796_s9 }
  0x37   : > { %1061 = dma.done.wait (%p1210_p6), %s168_s19, 4096  }
  0x38   : > { %1063 = vsyncadd (%p1210_p6), %s168_s19, 4294963200 }
  0x39   : > { %177 = sfence }
  0x3a   : > { %s191_s17 = sand.u32 1, %s1074_s10   ;;  %p798_p3 = scmp.ne.s32.totalorder %s1094_s15, 0 }
  0x3b   : > { %s1289_s24 = sshll.u32 %s191_s17, 3 }
  0x3c   : > { %s193_s23 = scalar_lea.vmem [#allocation10], %s1289_s24  ;;  %198 = sbr.rel (%p798_p3) target bundleno = 68 (0x44), region = 40 }
  0x41   : > { %vm199_vm0 = vcmask 261120   ;;  %v1116_v0 = vmov 0.0   ;;  %v1117_v1 = vmov -inf  }
  0x42   : > { %200 = vst.msk [vmem:[#allocation2] sm:$0xff] %vm199_vm0, %v1116_v0 }
  0x43   : > { %201 = vst.msk [vmem:[#allocation3] sm:$0xff] %vm199_vm0, %v1117_v1 }
  0x44 PF: > { %v1294_v2 = vld [vmem:[%s1280_s22 + $0x20] sm:$0xff]  ;;  %v1297_v3 = vld [vmem:[%s1280_s22 + $0x10] sm:$0xff]  ;;  %v207_v5 = vld [vmem:[%s1280_s22 + $0x28] sm:$0xff]  ;;  %v331_v34 = vlaneseq  ;;  %vm336_vm1 = vcmask 130112   ;;  %vm340_vm2 = vcmask 195712   ;;  %vm344_vm3 = vcmask 261312  }
  0x45   : > { %v202_v4 = vld [vmem:[%s1280_s22] sm:$0xff]  ;;  %243 = vadd.xlane.f32.xlu2 %v1294_v2  ;;  %239 = vadd.xlane.f32.xlu1 %v1297_v3  ;;  %v205_v6 = vld [vmem:[%s1280_s22 + $0x18] sm:$0xff]  ;;  %v203_v7 = vld [vmem:[%s1280_s22 + $0x8] sm:$0xff]  ;;  %vm395_vm4 = vcmask 1041409   ;;  %vm397_vm5 = vcmask 1042434   ;;  %vm399_vm6 = vcmask 1043459  }
  0x46   : > { %235 = vadd.xlane.f32.xlu0 %v202_v4  ;;  %v210_v8 = vld [vmem:[%s1280_s22 + $0x40] sm:$0xff]  ;;  %v209_v9 = vld [vmem:[%s1280_s22 + $0x38] sm:$0xff]  ;;  %v208_v10 = vld [vmem:[%s1280_s22 + $0x30] sm:$0xff]  ;;  %v1381_v38 = vand.u32 127, %v331_v34  ;;  %vm401_vm7 = vcmask 1044484   ;;  %vm403_vm8 = vcmask 1045509  }
  0x47   : > { %v213_v11 = vld [vmem:[%s1280_s22 + $0x58] sm:$0xff]  ;;  %v212_v12 = vld [vmem:[%s1280_s22 + $0x50] sm:$0xff]  ;;  %v211_v13 = vld [vmem:[%s1280_s22 + $0x48] sm:$0xff]  ;;  %vm405_vm9 = vcmask 1046534   ;;  %vm407_vm10 = vcmask 1047559   ;;  %vm411_vm11 = vcmask 261120  }
  0x48   : > { %v216_v14 = vld [vmem:[%s1280_s22 + $0x70] sm:$0xff]  ;;  %v215_v15 = vld [vmem:[%s1280_s22 + $0x68] sm:$0xff]  ;;  %v214_v16 = vld [vmem:[%s1280_s22 + $0x60] sm:$0xff]  ;;  %v1384_v39 = vadd.s32 4294967288, %v1381_v38  ;;  %v1387_v40 = vadd.s32 4294967272, %v1381_v38  ;;  %v1390_v41 = vadd.s32 4294967280, %v1381_v38 }
  0x49   : > { %v1315_v17 = vld [vmem:[%s1280_s22 + $0x88] sm:$0xff]  ;;  %v218_v18 = vld [vmem:[%s1280_s22 + $0x80] sm:$0xff]  ;;  %v1319_v19 = vld [vmem:[%s1280_s22 + $0x78] sm:$0xff]  ;;  %p799_p6 = scmp.ne.s32.totalorder %s1094_s15, 1 }
  0x4a   : > { %v1324_v20 = vld [vmem:[%s1280_s22 + $0xa0] sm:$0xff]  ;;  %v1327_v21 = vld [vmem:[%s1280_s22 + $0x98] sm:$0xff]  ;;  %v1330_v22 = vld [vmem:[%s1280_s22 + $0x90] sm:$0xff]  ;;  %s1119_s26 = smov (!%p799_p6), 1   ;;  %s801_s27 = sld [smem:[#allocation5 + $0x2]] (!%p799_p6) }
  0x4b   : > { %v1336_v23 = vld [vmem:[%s1280_s22 + $0xb8] sm:$0xff]  ;;  %v1339_v24 = vld [vmem:[%s1280_s22 + $0xb0] sm:$0xff]  ;;  %v1342_v25 = vld [vmem:[%s1280_s22 + $0xa8] sm:$0xff]  ;;  %s800_s28 = sld [smem:[#allocation5 + $0x1]] (!%p799_p6)  ;;  %s1120_s15 = smov (!%p799_p6), 126  }
  0x4c   : > { %v1348_v26 = vld [vmem:[%s1280_s22 + $0xd0] sm:$0xff]  ;;  %v1351_v27 = vld [vmem:[%s1280_s22 + $0xc8] sm:$0xff]  ;;  %v1354_v28 = vld [vmem:[%s1280_s22 + $0xc0] sm:$0xff]  ;;  %s1121_s4 = smov (!%p799_p6), 127   ;;  %s600_s5 = sld [smem:[#allocation5]] (!%p799_p6) }
  0x4d   : > { %245 = vadd.xlane.f32.xlu2 %v207_v5  ;;  %241 = vadd.xlane.f32.xlu1 %v205_v6  ;;  %v1360_v29 = vld [vmem:[%s1280_s22 + $0xe8] sm:$0xff]  ;;  %v1363_v30 = vld [vmem:[%s1280_s22 + $0xe0] sm:$0xff]  ;;  %v1366_v31 = vld [vmem:[%s1280_s22 + $0xd8] sm:$0xff] }
  0x4e   : > { %237 = vadd.xlane.f32.xlu0 %v203_v7  ;;  %v1372_v32 = vld [vmem:[%s1280_s22 + $0xf8] sm:$0xff]  ;;  %v1375_v33 = vld [vmem:[%s1280_s22 + $0xf0] sm:$0xff] }
  0x55   : > { %251 = vadd.xlane.f32.xlu2 %v210_v8  ;;  %249 = vadd.xlane.f32.xlu1 %v209_v9 }
  0x56   : > { %247 = vadd.xlane.f32.xlu0 %v208_v10 }
  0x5d   : > { %257 = vadd.xlane.f32.xlu2 %v213_v11  ;;  %255 = vadd.xlane.f32.xlu1 %v212_v12 }
  0x5e   : > { %253 = vadd.xlane.f32.xlu0 %v211_v13 }
  0x65   : > { %263 = vadd.xlane.f32.xlu2 %v216_v14  ;;  %261 = vadd.xlane.f32.xlu1 %v215_v15 }
  0x66   : > { %259 = vadd.xlane.f32.xlu0 %v214_v16 }
  0x6d   : > { %269 = vadd.xlane.f32.xlu2 %v1315_v17  ;;  %267 = vadd.xlane.f32.xlu1 %v218_v18 }
  0x6e   : > { %265 = vadd.xlane.f32.xlu0 %v1319_v19 }
  0x75   : > { %275 = vadd.xlane.f32.xlu2 %v1324_v20  ;;  %273 = vadd.xlane.f32.xlu1 %v1327_v21 }
  0x76   : > { %271 = vadd.xlane.f32.xlu0 %v1330_v22 }
  0x7d   : > { %281 = vadd.xlane.f32.xlu2 %v1336_v23  ;;  %279 = vadd.xlane.f32.xlu1 %v1339_v24 }
  0x7e   : > { %277 = vadd.xlane.f32.xlu0 %v1342_v25 }
  0x85   : > { %287 = vadd.xlane.f32.xlu2 %v1348_v26  ;;  %285 = vadd.xlane.f32.xlu1 %v1351_v27 }
  0x86   : > { %283 = vadd.xlane.f32.xlu0 %v1354_v28 }
  0x8d   : > { %293 = vadd.xlane.f32.xlu2 %v1360_v29  ;;  %291 = vadd.xlane.f32.xlu1 %v1363_v30 }
  0x8e   : > { %289 = vadd.xlane.f32.xlu0 %v1366_v31 }
  0x95   : > { %297 = vadd.xlane.f32.xlu1 %v1372_v32  ;;  %414 = vmax.xlane.f32.xlu2 %v202_v4 }
  0x96   : > { %295 = vadd.xlane.f32.xlu0 %v1375_v33 }
  0x9d   : > { %418 = vmax.xlane.f32.xlu1 %v1297_v3  ;;  %420 = vmax.xlane.f32.xlu2 %v205_v6 }
  0x9e   : > { %416 = vmax.xlane.f32.xlu0 %v203_v7 }
  0xa5   : > { %424 = vmax.xlane.f32.xlu1 %v207_v5  ;;  %426 = vmax.xlane.f32.xlu2 %v208_v10 }
  0xa6   : > { %422 = vmax.xlane.f32.xlu0 %v1294_v2 }
  0xad   : > { %430 = vmax.xlane.f32.xlu1 %v210_v8  ;;  %432 = vmax.xlane.f32.xlu2 %v211_v13 }
  0xae   : > { %428 = vmax.xlane.f32.xlu0 %v209_v9 }
  0xb5   : > { %436 = vmax.xlane.f32.xlu1 %v213_v11  ;;  %438 = vmax.xlane.f32.xlu2 %v214_v16 }
  0xb6   : > { %434 = vmax.xlane.f32.xlu0 %v212_v12 }
  0xb8   : > { %v244_v35 = vpop.xlane.xlu2 %243  ;;  %v240_v36 = vpop.xlane.xlu1 %239 }
  0xb9   : > { %v236_v37 = vpop.xlane.xlu0 %235  ;;  %v339_v48 = vperm.slane %v240_v36, %v1390_v41  ;;  %v346_v52 = vperm.slane %v244_v35, %v1381_v38 }
  0xba   : > { %v333_v45 = vperm.slane %v236_v37, %v1381_v38 }
  0xbd   : > { %442 = vmax.xlane.f32.xlu1 %v216_v14  ;;  %446 = vmax.xlane.f32.xlu2 %v218_v18 }
  0xbe   : > { %440 = vmax.xlane.f32.xlu0 %v215_v15 }
  0xc0   : > { %v246_v42 = vpop.xlane.xlu2 %245  ;;  %v242_v43 = vpop.xlane.xlu1 %241 }
  0xc1   : > { %v238_v44 = vpop.xlane.xlu0 %237  ;;  %v343_v46 = vperm.slane %v242_v43, %v1387_v40  ;;  %v347_v53 = vperm.slane %v246_v42, %v1384_v39 }
  0xc2   : > { %v335_v47 = vperm.slane %v238_v44, %v1384_v39 }
  0xc3   : > { %v348_v59 = vsel %vm336_vm1, %v347_v53, %v346_v52 }
  0xc4   : > { %v337_v49 = vsel %vm336_vm1, %v335_v47, %v333_v45 }
  0xc5   : > { %v341_v50 = vsel %vm340_vm2, %v339_v48, %v337_v49  ;;  %444 = vmax.xlane.f32.xlu1 %v1319_v19  ;;  %450 = vmax.xlane.f32.xlu2 %v1330_v22 }
  0xc6   : > { %v345_v51 = vsel %vm344_vm3, %v343_v46, %v341_v50  ;;  %448 = vmax.xlane.f32.xlu0 %v1315_v17 }
  0xc8   : > { %v252_v54 = vpop.xlane.xlu2 %251  ;;  %v250_v55 = vpop.xlane.xlu1 %249 }
  0xc9   : > { %v351_v56 = vperm.slane %v250_v55, %v1387_v40  ;;  %v248_v57 = vpop.xlane.xlu0 %247  ;;  %v353_v17 = vperm.slane %v252_v54, %v1381_v38 }
  0xca   : > { %v349_v58 = vperm.slane %v248_v57, %v1390_v41 }
  0xcc   : > { %v350_v60 = vsel %vm340_vm2, %v349_v58, %v348_v59 }
  0xcd   : > { %v352_v61 = vsel %vm344_vm3, %v351_v56, %v350_v60  ;;  %456 = vmax.xlane.f32.xlu1 %v1342_v25  ;;  %452 = vmax.xlane.f32.xlu2 %v1327_v21 }
  0xce   : > { %v1412_v62 = vsel %vm395_vm4, %v352_v61, %v345_v51  ;;  %454 = vmax.xlane.f32.xlu0 %v1324_v20 }
  0xd0   : > { %v258_v63 = vpop.xlane.xlu2 %257  ;;  %v256_v0 = vpop.xlane.xlu1 %255 }
  0xd1   : > { %v254_v1 = vpop.xlane.xlu0 %253  ;;  %v356_v19 = vperm.slane %v256_v0, %v1390_v41 }
  0xd2   : > { %v354_v18 = vperm.slane %v254_v1, %v1384_v39 }
  0xd4   : > { %v355_v22 = vsel %vm336_vm1, %v354_v18, %v353_v17 }
  0xd5   : > { %462 = vmax.xlane.f32.xlu1 %v1354_v28  ;;  %464 = vmax.xlane.f32.xlu2 %v1351_v27  ;;  %v358_v27 = vperm.slane %v258_v63, %v1387_v40 }
  0xd6   : > { %458 = vmax.xlane.f32.xlu0 %v1339_v24 }
  0xd8   : > { %v264_v2 = vpop.xlane.xlu2 %263  ;;  %v262_v3 = vpop.xlane.xlu1 %261 }
  0xd9   : > { %v260_v4 = vpop.xlane.xlu0 %259  ;;  %v363_v34 = vperm.slane %v264_v2, %v1390_v41 }
  0xda   : > { %v360_v24 = vperm.slane %v260_v4, %v1381_v38 }
  0xdd   : > { %466 = vmax.xlane.f32.xlu1 %v1348_v26  ;;  %470 = vmax.xlane.f32.xlu2 %v1363_v30 }
  0xde   : > { %460 = vmax.xlane.f32.xlu0 %v1336_v23  ;;  %v361_v23 = vperm.slane %v262_v3, %v1384_v39 }
  0xe0   : > { %v270_v5 = vpop.xlane.xlu2 %269  ;;  %v268_v6 = vpop.xlane.xlu1 %267  ;;  %v362_v42 = vsel %vm336_vm1, %v361_v23, %v360_v24 }
  0xe1   : > { %v266_v7 = vpop.xlane.xlu0 %265  ;;  %v368_v20 = vperm.slane %v270_v5, %v1384_v39  ;;  %v367_v21 = vperm.slane %v268_v6, %v1381_v38  ;;  %v364_v52 = vsel %vm340_vm2, %v363_v34, %v362_v42 }
  0xe2   : > { %v365_v43 = vperm.slane %v266_v7, %v1387_v40  ;;  %v234_v7 = vld [vmem:[#allocation2] sm:$0xff] }
  0xe4   : > { %v366_v56 = vsel %vm344_vm3, %v365_v43, %v364_v52 }
  0xe5   : > { %468 = vmax.xlane.f32.xlu1 %v1366_v31  ;;  %474 = vmax.xlane.f32.xlu2 %v1375_v33  ;;  %v357_v31 = vsel %vm340_vm2, %v356_v19, %v355_v22 }
  0xe6   : > { %472 = vmax.xlane.f32.xlu0 %v1360_v29  ;;  %v359_v45 = vsel %vm344_vm3, %v358_v27, %v357_v31 }
  0xe7   : > { %v398_v57 = vsel %vm397_vm5, %v359_v45, %v1412_v62 }
  0xe8   : > { %v276_v8 = vpop.xlane.xlu2 %275  ;;  %v274_v9 = vpop.xlane.xlu1 %273  ;;  %v400_v3 = vsel %vm399_vm6, %v366_v56, %v398_v57 }
  0xe9   : > { %v272_v10 = vpop.xlane.xlu0 %271  ;;  %v374_v25 = vperm.slane %v276_v8, %v1381_v38  ;;  %v372_v46 = vperm.slane %v274_v9, %v1387_v40 }
  0xea   : > { %v370_v28 = vperm.slane %v272_v10, %v1390_v41 }
  0xee   : > { %476 = vmax.xlane.f32.xlu0 %v1372_v32  ;;  %v369_v32 = vsel %vm336_vm1, %v368_v20, %v367_v21 }
  0xef   : > { %v371_v47 = vsel %vm340_vm2, %v370_v28, %v369_v32 }
  0xf0   : > { %v282_v11 = vpop.xlane.xlu2 %281  ;;  %v280_v12 = vpop.xlane.xlu1 %279  ;;  %v373_v58 = vsel %vm344_vm3, %v372_v46, %v371_v47 }
  0xf1   : > { %v278_v13 = vpop.xlane.xlu0 %277  ;;  %v377_v35 = vperm.slane %v280_v12, %v1390_v41  ;;  %v379_v48 = vperm.slane %v282_v11, %v1387_v40  ;;  %v402_v5 = vsel %vm401_vm7, %v373_v58, %v400_v3 }
  0xf2   : > { %v375_v26 = vperm.slane %v278_v13, %v1384_v39 }
  0xf4   : > { %v376_v44 = vsel %vm336_vm1, %v375_v26, %v374_v25 }
  0xf5   : > { %v378_v53 = vsel %vm340_vm2, %v377_v35, %v376_v44 }
  0xf6   : > { %v380_v61 = vsel %vm344_vm3, %v379_v48, %v378_v53 }
  0xf7   : > { %v404_v6 = vsel %vm403_vm8, %v380_v61, %v402_v5 }
  0xf8   : > { %v288_v14 = vpop.xlane.xlu2 %287  ;;  %v286_v15 = vpop.xlane.xlu1 %285 }
  0xf9   : > { %v284_v16 = vpop.xlane.xlu0 %283  ;;  %v382_v36 = vperm.slane %v286_v15, %v1384_v39  ;;  %v384_v49 = vperm.slane %v288_v14, %v1390_v41 }
  0xfa   : > { %v381_v37 = vperm.slane %v284_v16, %v1381_v38 }
  0xfc   : > { %v383_v54 = vsel %vm336_vm1, %v382_v36, %v381_v37 }
  0xfd   : > { %v385_v0 = vsel %vm340_vm2, %v384_v49, %v383_v54 }
 0x100   : > { %v294_v29 = vpop.xlane.xlu2 %293  ;;  %v292_v30 = vpop.xlane.xlu1 %291 }
 0x101   : > { %v290_v33 = vpop.xlane.xlu0 %289  ;;  %v389_v50 = vperm.slane %v294_v29, %v1384_v39  ;;  %v388_v51 = vperm.slane %v292_v30, %v1381_v38 }
 0x102   : > { %v386_v55 = vperm.slane %v290_v33, %v1387_v40 }
 0x103   : > { %v390_v63 = vsel %vm336_vm1, %v389_v50, %v388_v51 }
 0x104   : > { %v387_v62 = vsel %vm344_vm3, %v386_v55, %v385_v0 }
 0x105   : > { %v406_v9 = vsel %vm405_vm9, %v387_v62, %v404_v6 }
 0x108   : > { %v298_v59 = vpop.xlane.xlu1 %297  ;;  %v415_v60 = vpop.xlane.xlu2 %414 }
 0x109   : > { %v393_v1 = vperm.slane %v298_v59, %v1387_v40  ;;  %v296_v2 = vpop.xlane.xlu0 %295  ;;  %v510_v13 = vperm.slane %v415_v60, %v1381_v38 }
 0x10a   : > { %v391_v4 = vperm.slane %v296_v2, %v1390_v41 }
 0x10c   : > { %v392_v8 = vsel %vm340_vm2, %v391_v4, %v390_v63 }
 0x10d   : > { %v394_v10 = vsel %vm344_vm3, %v393_v1, %v392_v8 }
 0x10e   : > { %v408_v11 = vsel %vm407_vm10, %v394_v10, %v406_v9 }
 0x10f   : > { %v410_v12 = vadd.f32 %v408_v11, %v234_v7 }
 0x110   : > { %v419_v14 = vpop.xlane.xlu1 %418  ;;  %v421_v15 = vpop.xlane.xlu2 %420 }
 0x111   : > { %412 = vst.msk [vmem:[#allocation2] sm:$0xff] %vm411_vm11, %v410_v12  ;;  %v513_v16 = vperm.slane %v419_v14, %v1390_v41  ;;  %v417_v17 = vpop.xlane.xlu0 %416  ;;  %v515_v18 = vperm.slane %v421_v15, %v1387_v40 }
 0x112   : > { %v511_v19 = vperm.slane %v417_v17, %v1384_v39 }
 0x114   : > { %v512_v20 = vsel %vm336_vm1, %v511_v19, %v510_v13 }
 0x115   : > { %v514_v21 = vsel %vm340_vm2, %v513_v16, %v512_v20 }
 0x116   : > { %v516_v22 = vsel %vm344_vm3, %v515_v18, %v514_v21 }
 0x118   : > { %v425_v23 = vpop.xlane.xlu1 %424  ;;  %v427_v24 = vpop.xlane.xlu2 %426 }
 0x119   : > { %v423_v25 = vpop.xlane.xlu0 %422  ;;  %v518_v26 = vperm.slane %v425_v23, %v1384_v39  ;;  %v520_v28 = vperm.slane %v427_v24, %v1390_v41 }
 0x11a   : > { %v517_v27 = vperm.slane %v423_v25, %v1381_v38 }
 0x11c   : > { %v519_v29 = vsel %vm336_vm1, %v518_v26, %v517_v27 }
 0x11d   : > { %v521_v34 = vsel %vm340_vm2, %v520_v28, %v519_v29 }
 0x120   : > { %v431_v30 = vpop.xlane.xlu1 %430  ;;  %v433_v31 = vpop.xlane.xlu2 %432 }
 0x121   : > { %v429_v32 = vpop.xlane.xlu0 %428  ;;  %v524_v57 = vperm.slane %v431_v30, %v1381_v38  ;;  %v525_v58 = vperm.slane %v433_v31, %v1384_v39 }
 0x122   : > { %v522_v33 = vperm.slane %v429_v32, %v1387_v40 }
 0x123   : > { %v526_v63 = vsel %vm336_vm1, %v525_v58, %v524_v57 }
 0x124   : > { %v523_v35 = vsel %vm344_vm3, %v522_v33, %v521_v34 }
 0x125   : > { %v566_v36 = vsel %vm395_vm4, %v523_v35, %v516_v22 }
 0x128   : > { %v437_v37 = vpop.xlane.xlu1 %436  ;;  %v439_v42 = vpop.xlane.xlu2 %438 }
 0x129   : > { %v435_v43 = vpop.xlane.xlu0 %434  ;;  %v531_v0 = vperm.slane %v439_v42, %v1381_v38  ;;  %v529_v62 = vperm.slane %v437_v37, %v1387_v40 }
 0x12a   : > { %v527_v61 = vperm.slane %v435_v43, %v1390_v41 }
 0x12c   : > { %v528_v4 = vsel %vm340_vm2, %v527_v61, %v526_v63 }
 0x12d   : > { %v530_v23 = vsel %vm344_vm3, %v529_v62, %v528_v4 }
 0x12e   : > { %v567_v31 = vsel %vm397_vm5, %v530_v23, %v566_v36  ;;  %v413_v36 = vld [vmem:[#allocation3] sm:$0xff] }
 0x130   : > { %v443_v44 = vpop.xlane.xlu1 %442  ;;  %v447_v45 = vpop.xlane.xlu2 %446 }
 0x131   : > { %v441_v46 = vpop.xlane.xlu0 %440  ;;  %v538_v2 = vperm.slane %v447_v45, %v1381_v38  ;;  %v534_v5 = vperm.slane %v443_v44, %v1390_v41 }
 0x132   : > { %v532_v1 = vperm.slane %v441_v46, %v1384_v39 }
 0x134   : > { %v533_v6 = vsel %vm336_vm1, %v532_v1, %v531_v0 }
 0x135   : > { %v535_v24 = vsel %vm340_vm2, %v534_v5, %v533_v6 }
 0x138   : > { %v445_v47 = vpop.xlane.xlu1 %444  ;;  %v451_v48 = vpop.xlane.xlu2 %450 }
 0x139   : > { %v449_v49 = vpop.xlane.xlu0 %448  ;;  %v536_v10 = vperm.slane %v445_v47, %v1387_v40  ;;  %v541_v11 = vperm.slane %v451_v48, %v1390_v41 }
 0x13a   : > { %v539_v3 = vperm.slane %v449_v49, %v1384_v39 }
 0x13b   : > { %v537_v27 = vsel %vm344_vm3, %v536_v10, %v535_v24 }
 0x13c   : > { %v540_v15 = vsel %vm336_vm1, %v539_v3, %v538_v2  ;;  %v568_v35 = vsel %vm399_vm6, %v537_v27, %v567_v31 }
 0x13d   : > { %v542_v28 = vsel %vm340_vm2, %v541_v11, %v540_v15 }
 0x140   : > { %v457_v50 = vpop.xlane.xlu1 %456  ;;  %v453_v51 = vpop.xlane.xlu2 %452 }
 0x141   : > { %v455_v52 = vpop.xlane.xlu0 %454  ;;  %v546_v12 = vperm.slane %v457_v50, %v1384_v39  ;;  %v543_v16 = vperm.slane %v453_v51, %v1387_v40 }
 0x142   : > { %v545_v13 = vperm.slane %v455_v52, %v1381_v38 }
 0x143   : > { %v544_v30 = vsel %vm344_vm3, %v543_v16, %v542_v28 }
 0x144   : > { %v547_v29 = vsel %vm336_vm1, %v546_v12, %v545_v13  ;;  %v569_v43 = vsel %vm401_vm7, %v544_v30, %v568_v35 }
 0x148   : > { %v463_v53 = vpop.xlane.xlu1 %462  ;;  %v465_v54 = vpop.xlane.xlu2 %464 }
 0x149   : > { %v459_v55 = vpop.xlane.xlu0 %458  ;;  %v552_v7 = vperm.slane %v463_v53, %v1381_v38  ;;  %v553_v8 = vperm.slane %v465_v54, %v1384_v39 }
 0x14a   : > { %v548_v17 = vperm.slane %v459_v55, %v1390_v41 }
 0x14b   : > { %v554_v25 = vsel %vm336_vm1, %v553_v8, %v552_v7 }
 0x150   : > { %v467_v56 = vpop.xlane.xlu1 %466  ;;  %v471_v60 = vpop.xlane.xlu2 %470 }
 0x151   : > { %v461_v59 = vpop.xlane.xlu0 %460  ;;  %v555_v18 = vperm.slane %v467_v56, %v1390_v41  ;;  %v559_v20 = vperm.slane %v471_v60, %v1381_v38  ;;  %v549_v38 = vsel %vm340_vm2, %v548_v17, %v547_v29 }
 0x152   : > { %v550_v19 = vperm.slane %v461_v59, %v1387_v40 }
 0x153   : > { %v556_v32 = vsel %vm340_vm2, %v555_v18, %v554_v25 }
 0x154   : > { %v551_v33 = vsel %vm344_vm3, %v550_v19, %v549_v38 }
 0x155   : > { %v570_v45 = vsel %vm403_vm8, %v551_v33, %v569_v43 }
 0x158   : > { %v469_v14 = vpop.xlane.xlu1 %468  ;;  %v475_v22 = vpop.xlane.xlu2 %474 }
 0x159   : > { %v473_v9 = vpop.xlane.xlu0 %472  ;;  %v557_v26 = vperm.slane %v469_v14, %v1387_v40 }
 0x15a   : > { %v560_v21 = vperm.slane %v473_v9, %v1384_v39  ;;  %v562_v39 = vperm.slane %v475_v22, %v1390_v41 }
 0x15b   : > { %v558_v37 = vsel %vm344_vm3, %v557_v26, %v556_v32 }
 0x15c   : > { %v561_v34 = vsel %vm336_vm1, %v560_v21, %v559_v20  ;;  %v571_v46 = vsel %vm405_vm9, %v558_v37, %v570_v45 }
 0x15d   : > { %v563_v41 = vsel %vm340_vm2, %v562_v39, %v561_v34 }
 0x161   : > { %v477_v42 = vpop.xlane.xlu0 %476 }
 0x162   : > { %v564_v44 = vperm.slane %v477_v42, %v1387_v40 }
 0x164   : > { %v565_v47 = vsel %vm344_vm3, %v564_v44, %v563_v41  ;;  %579 = sbr.rel (%p799_p6) target bundleno = 647 (0x287), region = 44 }
 0x165   : > { %v572_v48 = vsel %vm407_vm10, %v565_v47, %v571_v46 }
 0x166   : > { %v574_v49 = vmax.f32 %v413_v36, %v572_v48 }
 0x168   : > { %575 = vst.msk [vmem:[#allocation3] sm:$0xff] %vm411_vm11, %v574_v49 }
 0x169   : > { %v580_v50 = vld [vmem:[#allocation2] sm:$0xff]  ;;  %vm582_vm12 = vcmask 7168   ;;  %vm585_vm13 = vcmask 277768   ;;  %v1118_v51 = vmov 0.0   ;;  %vm592_vm14 = vcmask 269320  }
 0x16a   : > { %v581_v40 = vmul.f32 0.00390625, %v580_v50  ;;  %583 = vst.msk [vmem:[#allocation4] sm:$0xff] %vm582_vm12, %v1118_v51  ;;  %v621_v54 = vstv %s801_s27  ;;  %v607_v55 = vstv %s800_s28  ;;  %v603_v0 = vstv %s600_s5 }
 0x16b   : > { %586 = vst.msk [vmem:[#allocation4] sm:$0xff] %vm585_vm13, %v1118_v51 }
 0x16c   : > { %589 = vrot.lane.b32.xlu0 %v581_v40, %s1119_s26  ;;  %584 = vst.msk [vmem:[#allocation4 + $0x8] sm:$0xff] %vm582_vm12, %v1118_v51 }
 0x16d   : > { %587 = vst.msk [vmem:[#allocation4 + $0x8] sm:$0xff] %vm585_vm13, %v1118_v51 }
 0x16f   : > { %v594_v52 = vld [vmem:[#allocation3] sm:$0xff] }
 0x174   : > { %596 = vrot.lane.b32.xlu0 %v594_v52, %s1119_s26 }
 0x1de   : > { %v590_v53 = vpop.permute.xlu0 %589 }
 0x1df   : > { %593 = vst.msk [vmem:[#allocation4] sm:$0xff] %vm592_vm14, %v590_v53 }
 0x1e6   : > { %v597_v56 = vpop.permute.xlu0 %596  ;;  %v601_v57 = vld [vmem:[#allocation4] sm:$0xff] }
 0x1e7   : > { %599 = vst.msk [vmem:[#allocation4 + $0x8] sm:$0xff] %vm592_vm14, %v597_v56  ;;  %v622_v58 = vmul.f32 %v621_v54, %v601_v57  ;;  %v608_v59 = vmul.f32 %v607_v55, %v601_v57  ;;  %v604_v1 = vmul.f32 %v603_v0, %v601_v57 }
 0x1e9   : > { %626 = vrot.lane.b32.xlu2 %v622_v58, %s1120_s15  ;;  %612 = vrot.lane.b32.xlu1 %v608_v59, %s1121_s4 }
 0x1ee   : > { %v602_v60 = vld [vmem:[#allocation4 + $0x8] sm:$0xff] }
 0x1ef   : > { %v623_v61 = vmul.f32 %v621_v54, %v602_v60  ;;  %v609_v63 = vmul.f32 %v607_v55, %v602_v60  ;;  %v605_v6 = vmul.f32 %v603_v0, %v602_v60 }
 0x1f1   : > { %628 = vrot.lane.b32.xlu2 %v623_v61, %s1120_s15  ;;  %614 = vrot.lane.b32.xlu1 %v609_v63, %s1121_s4 }
 0x243   : > { %v627_v2 = vpop.permute.xlu2 %626 }
 0x24b   : > { %v629_v9 = vpop.permute.xlu2 %628 }
 0x25b   : > { %v613_v3 = vpop.permute.xlu1 %612 }
 0x25c   : > { %v618_v62 = vadd.f32 %v613_v3, %v604_v1 }
 0x25e   : > { %v632_v4 = vadd.f32 %v627_v2, %v618_v62 }
 0x260   : > { %v802_v5 = vmul.f32 -1.442695, %v632_v4 }
 0x262   : > { %931 = vpow2.f32 %v802_v5 }
 0x263   : > { %v615_v7 = vpop.permute.xlu1 %614 }
 0x264   : > { %v619_v8 = vadd.f32 %v615_v7, %v605_v6 }
 0x266   : > { %v633_v10 = vadd.f32 %v629_v9, %v619_v8 }
 0x268   : > { %v932_v11 = vpop.eup %931  ;;  %v803_v12 = vmul.f32 -1.442695, %v633_v10 }
 0x269   : > { %v640_v13 = vadd.f32 1.0, %v932_v11 }
 0x26a   : > { %933 = vpow2.f32 %v803_v12 }
 0x26b   : > { %935 = vrcp.f32 %v640_v13  ;;  %vm647_vm0 = vweird.f32 %v640_v13  ;;  %v653_v24 = vand.u32 2147483648, %v640_v13  ;;  %v651_v26 = vand.u32 2147483647, %v640_v13 }
 0x26d   : > { %v654_v38 = vor.u32 1.1754944e-38, %v653_v24  ;;  %vm652_vm5 = vcmp.eq.f32.partialorder %v651_v26, 8.507059e+37 }
 0x270   : > { %v934_v14 = vpop.eup %933 }
 0x271   : > { %v936_v15 = vpop.eup %935  ;;  %v641_v16 = vadd.f32 1.0, %v934_v14 }
 0x272   : > { %v643_v17 = vmul.f32 %v936_v15, %v640_v13  ;;  %vm648_vm15 = vweird.f32 %v936_v15 }
 0x273   : > { %937 = vrcp.f32 %v641_v16  ;;  %v668_v25 = vand.u32 2147483648, %v641_v16  ;;  %v666_v28 = vand.u32 2147483647, %v641_v16  ;;  %vm649_vm2 = vmor %vm647_vm0, %vm648_vm15  ;;  %vm662_vm3 = vweird.f32 %v641_v16 }
 0x274   : > { %v644_v18 = vsub.f32 1.0, %v643_v17 }
 0x275   : > { %v669_v39 = vor.u32 1.1754944e-38, %v668_v25  ;;  %vm667_vm6 = vcmp.eq.f32.partialorder %v666_v28, 8.507059e+37 }
 0x276   : > { %v645_v19 = vmul.f32 %v936_v15, %v644_v18 }
 0x278   : > { %v646_v22 = vadd.f32 %v936_v15, %v645_v19 }
 0x279   : > { %v938_v20 = vpop.eup %937 }
 0x27a   : > { %v658_v21 = vmul.f32 %v938_v20, %v641_v16  ;;  %vm663_vm1 = vweird.f32 %v938_v20  ;;  %v650_v29 = vsel %vm649_vm2, %v936_v15, %v646_v22 }
 0x27b   : > { %vm664_vm4 = vmor %vm662_vm3, %vm663_vm1  ;;  %v655_v32 = vsel %vm652_vm5, %v654_v38, %v650_v29 }
 0x27c   : > { %v659_v23 = vsub.f32 1.0, %v658_v21 }
 0x27e   : > { %v660_v27 = vmul.f32 %v938_v20, %v659_v23 }
 0x280   : > { %v661_v30 = vadd.f32 %v938_v20, %v660_v27 }
 0x282   : > { %v665_v31 = vsel %vm664_vm4, %v938_v20, %v661_v30 }
 0x283   : > { %v670_v33 = vsel %vm667_vm6, %v669_v39, %v665_v31 }
 0x284   : > { %v672_v34 = vadd.f32 %v670_v33, %v655_v32 }
 0x286   : > { %673 = vst.msk [vmem:[%s193_s23] sm:$0xff] %vm411_vm11, %v672_v34 }
 0x287 PF: > { %s805_s12 = sshll.u32 %s1098_s16, 3  ;;  %s1629_s6 = sld [smem:[#allocation21_spill]] }
 0x288   : > { %s687_s30 = sshll.u32 %s193_s23, 4  ;;  %s675_s0 = scalar_lea.sflag [#allocation7], %s191_s17  ;;  %s688_s30 = int_to_ptr.vmem [resolvable:$true] %s687_s30 }
 0x28d   : > { %s685_s20 = scalar_lea.hbm %s1629_s6, %s805_s12  ;;  %s1004_s26 = scalar_lea.hbm %s1629_s6, 16 }
 0x28e   : > { %s689_s29 = sshll.u32 %s685_s20, 4  ;;  %s690_s29 = int_to_ptr.hbm [resolvable:$true] %s689_s29 }
 0x28f   : > { %s998_s9 = sshra.s32 %s690_s29, 4  ;;  %s999_s9 = int_to_ptr.hbm [resolvable:$true] %s998_s9 }
 0x290   : > { %s1000_s19 = scalar_lea.hbm %s999_s9, 8  ;;  %p1005_p2 = scmp.lt.s32.totalorder %s999_s9, %s1629_s6 }
 0x291   : > { %p1001_p13 = scmp.ne.s32.totalorder %s999_s9, %s1000_s19  ;;  %p1006_p5 = scmp.lt.s32.totalorder %s1004_s26, %s1000_s19 }
 0x293   : > { %p1002_p0 = pnand %p1001_p13, %p1216_p10  ;;  %p1007_p7 = por %p1006_p5, %p1005_p2 }
 0x295   : > { %p1003_p1 = pneg %p1002_p0 }
 0x297   : > { %p1008_p8 = pnand %p1007_p7, %p1003_p1 }
 0x299   : > { %1011 = shalt.err (!%p1008_p8)
}
 0x29a   : > { %815 = dma.vmem_to_hbm [thread:$0]  (%p1216_p10), %s688_s30, 128, %s690_s29, %s675_s0  }
 0x29b PF: > { %s1630_s17 = sld [smem:[#allocation16_spill]] }
 0x29c   : > { %s1631_s24 = sld [smem:[#allocation14_spill]] }
 0x2a1   : > { %p832_p4 = scmp.ge.s32.totalorder %s1630_s17, 2 }
 0x2a2   : > { %s701_s15 = sand.u32 1, %s1631_s24  }
 0x2a3   : > { %p826_p9 = pnand %p832_p4, %p1221_p12  ;;  %s702_s4 = scalar_lea.sflag [#allocation7], %s701_s15 }
 0x2a5   : > { %p827_p11 = pneg %p826_p9 }
 0x2a7   : > { %1065 = dma.done.wait (%p827_p11), %s702_s4, 128  }
 0x2a8   : > { %1067 = vsyncadd (%p827_p11), %s702_s4, 4294967168  ;;  %s19_s19 = sadd.s32 1, %s1630_s17   ;;  %s1633_s15 = sld [smem:[#allocation15_spill]] }
 0x2a9   : > { %p16_p3 = scmp.ge.s32.totalorder %s19_s19, 6   ;;  %s1634_s17 = sld [smem:[#allocation19_spill]] }
 0x2aa   : > { %s1635_s9 = smov %s1074_s10  ;;  %s1636_s10 = smov %s1078_s11 }
 0x2ab   : > { %s1637_s11 = smov %s1264_s2  ;;  %s1638_s12 = smov %s1086_s13 }
 0x2ac   : > { %s1639_s13 = smov %s1090_s14  ;;  %s1640_s14 = smov %s1269_s25 }
 0x2ad   : > { %s1641_s16 = smov %s1106_s18  ;;  %s1642_s18 = smov %s1648_s8 }
 0x2ae   :  { %18 = sbr.rel (!%p16_p3) target bundleno = 13 (0xd), region = 86 }
 0x2b3   :  { %708 = vsyncpa [#allocation6], 1 }
 0x2b4   :  { %710 = vsyncpa [#allocation6 + $0x1], 1 }
 0x2b5   :  { %711 = vsyncpa [#allocation7], 1 }
 0x2b6   :  { %713 = vsyncpa [#allocation7 + $0x1], 1 }
 0x2b7   :  { %714 = vsyncpa [#allocation8], 1 }
 0x2b8   :  { %716 = vsyncpa [#allocation8 + $0x1], 1 }

</bundles_post_ra>
